<compile_context>
chip_gen: v7x
topology: tpu7x:2x2x1
jax: 0.10.0
libtpu: 0.0.40
codegen_flags: <defaults>
</compile_context>

<pallas_src>
import functools

import jax
import jax.numpy as jnp
from jax import lax
from jax.experimental import pallas as pl
from jax.experimental.pallas import tpu as pltpu


# ------------------------------- Pass 1: EMA --------------------------------

def _shift_down(v, k, fill):
    """out[i] = v[i - k] for i >= k, else `fill`.

    (pltpu.roll + mask would also work; pad+slice keeps the shift direction
    explicit and unambiguous.)"""
    pad = jnp.full((k, v.shape[1]), fill, v.dtype)
    return jnp.concatenate([pad, v[: v.shape[0] - k, :]], axis=0)


def _ema_kernel(x_ref, alpha_ref, ema_ref, h_carry):
    """One sequence chunk of the damped EMA, carrying state across chunks."""
    @pl.when(pl.program_id(0) == 0)
    def _():
        h_carry[...] = jnp.zeros_like(h_carry)

    tm, d = x_ref.shape
    alpha = alpha_ref[...].astype(jnp.float32)        # (1, d); loaded once
    x = x_ref[...].astype(jnp.float32)                # (tm, d); single load

    # Row t holds the affine map h -> A_t*h + B_t of step t; a Hillis-Steele
    # scan composes prefixes in ceil(log2(tm)) full-vreg VALU steps.
    A = jnp.broadcast_to(1.0 - alpha, (tm, d))        # hoisted (1 - alpha)
    B = alpha * x
    k = 1
    while k < tm:                                     # static: log2(tm) steps
        A_prev = _shift_down(A, k, 1.0)               # identity-map fill
        B_prev = _shift_down(B, k, 0.0)
        B = A * B_prev + B                            # compose f_t o f_{t-k}
        A = A * A_prev
        k *= 2

    h = A * h_carry[...] + B                          # fold carried prefix state
    ema_ref[...] = h                                  # one dense store / chunk
    h_carry[...] = h[tm - 1:tm, :]                    # carry last row forward


def _ema_pallas(x, alpha, *, chunk):
    m, d = x.shape
    return pl.pallas_call(
        _ema_kernel,
        out_shape=jax.ShapeDtypeStruct((m, d), jnp.float32),
        grid_spec=pltpu.PrefetchScalarGridSpec(
            num_scalar_prefetch=0,
            grid=(m // chunk,),
            in_specs=[
                pl.BlockSpec((chunk, d), lambda i: (i, 0)),   # x chunk
                pl.BlockSpec((1, d), lambda i: (0, 0)),       # alpha
            ],
            out_specs=pl.BlockSpec((chunk, d), lambda i: (i, 0)),
            scratch_shapes=[pltpu.VMEM((1, d), jnp.float32)],  # carried h state
        ),
        compiler_params=pltpu.CompilerParams(
            dimension_semantics=("arbitrary",)),               # sequential carry
    )(x, alpha)


# ---------------------- Pass 2: flash-style attention -----------------------

def _attn_kernel(q_ref, k_ref, v_ref, o_ref, m_sc, l_sc, acc_sc,
                 *, mxu_dtype, approx_recip):
    kv = pl.program_id(1)

    @pl.when(kv == 0)
    def _():
        m_sc[...] = jnp.full_like(m_sc, -jnp.inf)
        l_sc[...] = jnp.zeros_like(l_sc)
        acc_sc[...] = jnp.zeros_like(acc_sc)

    q = q_ref[...].astype(mxu_dtype)
    k = k_ref[...].astype(mxu_dtype)
    # logits[i, j] = q_i . k_j : contract on d for both operands (no .T / XLU).
    s = lax.dot_general(q, k, dimension_numbers=(((1,), (1,)), ((), ())),
                        preferred_element_type=jnp.float32)        # (tq, tk)

    m_prev = m_sc[...]
    m_new = jnp.maximum(m_prev, jnp.max(s, axis=-1, keepdims=True))
    corr = jnp.exp(m_prev - m_new)
    p = jnp.exp(s - m_new)
    l_sc[...] = corr * l_sc[...] + jnp.sum(p, axis=-1, keepdims=True)
    acc_sc[...] = corr * acc_sc[...] + jnp.dot(
        p.astype(mxu_dtype), v_ref[...].astype(mxu_dtype),
        preferred_element_type=jnp.float32)
    m_sc[...] = m_new

    @pl.when(kv == pl.num_programs(1) - 1)
    def _():
        inv_l = pl.reciprocal(l_sc[...], approx=approx_recip)
        o_ref[...] = (acc_sc[...] * inv_l).astype(o_ref.dtype)


def _attn_pallas(ema, x, *, tq, tk, mxu_dtype, approx_recip):
    m, d = x.shape
    kernel = functools.partial(_attn_kernel, mxu_dtype=mxu_dtype,
                               approx_recip=approx_recip)
    return pl.pallas_call(
        kernel,
        out_shape=jax.ShapeDtypeStruct((m, d), jnp.float32),
        grid_spec=pltpu.PrefetchScalarGridSpec(
            num_scalar_prefetch=0,
            grid=(m // tq, m // tk),
            in_specs=[
                pl.BlockSpec((tq, d), lambda qi, ki: (qi, 0)),   # Q = ema
                pl.BlockSpec((tk, d), lambda qi, ki: (ki, 0)),   # K = ema
                pl.BlockSpec((tk, d), lambda qi, ki: (ki, 0)),   # V = x
            ],
            out_specs=pl.BlockSpec((tq, d), lambda qi, ki: (qi, 0)),
            scratch_shapes=[
                pltpu.VMEM((tq, 1), jnp.float32),    # running max
                pltpu.VMEM((tq, 1), jnp.float32),    # running denominator
                pltpu.VMEM((tq, d), jnp.float32),    # f32 output accumulator
            ],
        ),
        compiler_params=pltpu.CompilerParams(
            # Query tiles shard across TensorCores (v7x megacore); the kv axis
            # is the sequential online-softmax reduction.
            dimension_semantics=("parallel", "arbitrary"),
            vmem_limit_bytes=32 * 1024 * 1024,   # fits v7x's 64 MiB w/ headroom
        ),
    )(ema, ema, x)


# -------------------------------- wrapper ------------------------------------

def mega_layer(x, alpha, *, mxu_dtype=jnp.bfloat16, ema_chunk=None,
               tq=None, tk=None):
    """x: (m, d) f32, alpha: (1, d) f32 EMA decay in (0,1) -> (m, d) f32."""
    m, d = x.shape
    assert m % 8 == 0, "sequence length must be a multiple of 8 sublanes"
    # TODO(synk): ragged m (not a multiple of the tile sizes) would need
    #             key-side masking in the attention pass.

    # Lane-dense layout: zero-pad the feature dim to a multiple of 128 lanes.
    # Zero padding is exact: padded EMA / V columns stay 0 and add 0 to logits.
    d_pad = ((d + 127) // 128) * 128
    x_p = x.astype(jnp.float32)
    a_p = alpha.astype(jnp.float32)
    if d_pad != d:
        x_p = jnp.pad(x_p, ((0, 0), (0, d_pad - d)))
        a_p = jnp.pad(a_p, ((0, 0), (0, d_pad - d)))

    ema_chunk = min(m, 256) if ema_chunk is None else ema_chunk
    tq = min(m, 128) if tq is None else tq
    tk = min(m, 128) if tk is None else tk
    assert m % ema_chunk == 0 and m % tq == 0 and m % tk == 0

    ema = _ema_pallas(x_p, a_p, chunk=ema_chunk)
    out = _attn_pallas(ema, x_p, tq=tq, tk=tk, mxu_dtype=mxu_dtype,
                       approx_recip=(mxu_dtype != jnp.float32))
    return out[:, :d]


def mega_layer_ref(x, alpha):
    """Pure-JAX reference (sequential EMA + exact softmax attention)."""
    def step(h, x_t):
        h = alpha[0] * x_t + (1.0 - alpha[0]) * h
        return h, h
    _, ema = lax.scan(step, jnp.zeros((x.shape[1],), jnp.float32), x)
    w = jax.nn.softmax(ema @ ema.T, axis=-1)
    return w @ x


if __name__ == "__main__":
    # Small shapes; tiles of 8 so the chunk-carry, online-softmax and
    # parallel-query code paths are all exercised.
    m, d = 16, 32
    key = jax.random.PRNGKey(0)
    kx, ka = jax.random.split(key)
    x = jax.random.normal(kx, (m, d), dtype=jnp.float32)
    alpha = jax.nn.sigmoid(jax.random.normal(ka, (1, d), dtype=jnp.float32))

    ref = mega_layer_ref(x, alpha)

    # f32-MXU path: fidelity check against the pure-JAX reference.
    out = mega_layer(x, alpha, mxu_dtype=jnp.float32, ema_chunk=8, tq=8, tk=8)
    jax.block_until_ready(out)
    assert out.shape == (m, d)
    assert jnp.allclose(out, ref, atol=2e-3, rtol=2e-3), "f32 mismatch vs reference"

    # bf16-MXU production config (f32 accumulation, approx softmax reciprocal):
    # looser smoke bound — bf16 rounding of the logits dominates the error.
    out_bf16 = mega_layer(x, alpha, ema_chunk=8, tq=8, tk=8)
    jax.block_until_ready(out_bf16)
    assert bool(jnp.all(jnp.isfinite(out_bf16)))
    assert float(jnp.max(jnp.abs(out_bf16 - ref))) < 0.25, "bf16 smoke check"

    print("KERNEL_OK")
</pallas_src>

<mosaic_0001>
module attributes {stable_mosaic.version = 11 : i64} {
  func.func @_ema_kernel(%arg0: i32, %arg1: memref<8x128xf32, #tpu.memory_space<vmem>>, %arg2: memref<1x128xf32, #tpu.memory_space<vmem>>, %arg3: memref<8x128xf32, #tpu.memory_space<vmem>>, %arg4: memref<1x128xf32, #tpu.memory_space<vmem>>) attributes {dimension_semantics = [#tpu.dimension_semantics<arbitrary>], iteration_bounds = array<i64: 2>, scalar_prefetch = 0 : i64, scratch_operands = 1 : i64, tpu.core_type = #tpu.core_type<tc>, window_params = [{transform_indices = @transform_0, window_bounds = array<i64: 8, 128>}, {pipeline_mode = #tpu.pipeline_mode<synchronous>, transform_indices = @transform_1, window_bounds = array<i64: 1, 128>}, {transform_indices = @transform_2, window_bounds = array<i64: 8, 128>}]} {
    %c0_i32 = arith.constant 0 : i32
    %0 = arith.cmpi eq, %arg0, %c0_i32 : i32
    %1 = arith.extui %0 : i1 to i32
    %c0_i32_0 = arith.constant 0 : i32
    %2 = arith.cmpi ne, %1, %c0_i32_0 : i32
    scf.if %2 {
      %cst_16 = arith.constant 0.000000e+00 : f32
      %45 = vector.broadcast %cst_16 : f32 to vector<1x128xf32>
      %c0_17 = arith.constant 0 : index
      %c0_18 = arith.constant 0 : index
      %46 = vector.load %arg4[%c0_17, %c0_18] : memref<1x128xf32, #tpu.memory_space<vmem>>, vector<1x128xf32>
      tpu.vector_store %arg4[%c0_17, %c0_18], %45 {strides = array<i32>} : memref<1x128xf32, #tpu.memory_space<vmem>>, vector<1x128xf32>,
    } else {
    }
    %c0 = arith.constant 0 : index
    %c0_1 = arith.constant 0 : index
    %3 = vector.load %arg2[%c0, %c0_1] : memref<1x128xf32, #tpu.memory_space<vmem>>, vector<1x128xf32>
    %c0_2 = arith.constant 0 : index
    %c0_3 = arith.constant 0 : index
    %4 = vector.load %arg1[%c0_2, %c0_3] : memref<8x128xf32, #tpu.memory_space<vmem>>, vector<8x128xf32>
    %cst = arith.constant 1.000000e+00 : f32
    %5 = vector.broadcast %cst : f32 to vector<1x128xf32>
    %6 = arith.subf %5, %3 : vector<1x128xf32>
    %7 = vector.shape_cast %6 : vector<1x128xf32> to vector<1x128xf32>
    %8 = vector.broadcast %7 : vector<1x128xf32> to vector<8x128xf32>
    %9 = vector.broadcast %3 : vector<1x128xf32> to vector<8x128xf32>
    %10 = arith.mulf %9, %4 : vector<8x128xf32>
    %cst_4 = arith.constant 1.000000e+00 : f32
    %11 = vector.broadcast %cst_4 : f32 to vector<1x128xf32>
    %12 = vector.extract_strided_slice %8 {offsets = [0, 0], sizes = [7, 128], strides = [1, 1]} : vector<8x128xf32> to vector<7x128xf32>
    %13 = tpu.concatenate %11, %12 in 0 : vector<1x128xf32>, vector<7x128xf32> -> vector<8x128xf32>
    %cst_5 = arith.constant 0.000000e+00 : f32
    %14 = vector.broadcast %cst_5 : f32 to vector<1x128xf32>
    %15 = vector.extract_strided_slice %10 {offsets = [0, 0], sizes = [7, 128], strides = [1, 1]} : vector<8x128xf32> to vector<7x128xf32>
    %16 = tpu.concatenate %14, %15 in 0 : vector<1x128xf32>, vector<7x128xf32> -> vector<8x128xf32>
    %17 = arith.mulf %8, %16 : vector<8x128xf32>
    %18 = arith.addf %17, %10 : vector<8x128xf32>
    %19 = arith.mulf %8, %13 : vector<8x128xf32>
    %cst_6 = arith.constant 1.000000e+00 : f32
    %20 = vector.broadcast %cst_6 : f32 to vector<2x128xf32>
    %21 = vector.extract_strided_slice %19 {offsets = [0, 0], sizes = [6, 128], strides = [1, 1]} : vector<8x128xf32> to vector<6x128xf32>
    %22 = tpu.concatenate %20, %21 in 0 : vector<2x128xf32>, vector<6x128xf32> -> vector<8x128xf32>
    %cst_7 = arith.constant 0.000000e+00 : f32
    %23 = vector.broadcast %cst_7 : f32 to vector<2x128xf32>
    %24 = vector.extract_strided_slice %18 {offsets = [0, 0], sizes = [6, 128], strides = [1, 1]} : vector<8x128xf32> to vector<6x128xf32>
    %25 = tpu.concatenate %23, %24 in 0 : vector<2x128xf32>, vector<6x128xf32> -> vector<8x128xf32>
    %26 = arith.mulf %19, %25 : vector<8x128xf32>
    %27 = arith.addf %26, %18 : vector<8x128xf32>
    %28 = arith.mulf %19, %22 : vector<8x128xf32>
    %cst_8 = arith.constant 1.000000e+00 : f32
    %29 = vector.broadcast %cst_8 : f32 to vector<4x128xf32>
    %30 = vector.extract_strided_slice %28 {offsets = [0, 0], sizes = [4, 128], strides = [1, 1]} : vector<8x128xf32> to vector<4x128xf32>
    %31 = tpu.concatenate %29, %30 in 0 : vector<4x128xf32>, vector<4x128xf32> -> vector<8x128xf32>
    %cst_9 = arith.constant 0.000000e+00 : f32
    %32 = vector.broadcast %cst_9 : f32 to vector<4x128xf32>
    %33 = vector.extract_strided_slice %27 {offsets = [0, 0], sizes = [4, 128], strides = [1, 1]} : vector<8x128xf32> to vector<4x128xf32>
    %34 = tpu.concatenate %32, %33 in 0 : vector<4x128xf32>, vector<4x128xf32> -> vector<8x128xf32>
    %35 = arith.mulf %28, %34 : vector<8x128xf32>
    %36 = arith.addf %35, %27 : vector<8x128xf32>
    %37 = arith.mulf %28, %31 : vector<8x128xf32>
    %c0_10 = arith.constant 0 : index
    %c0_11 = arith.constant 0 : index
    %38 = vector.load %arg4[%c0_10, %c0_11] : memref<1x128xf32, #tpu.memory_space<vmem>>, vector<1x128xf32>
    %39 = vector.broadcast %38 : vector<1x128xf32> to vector<8x128xf32>
    %40 = arith.mulf %37, %39 : vector<8x128xf32>
    %41 = arith.addf %40, %36 : vector<8x128xf32>
    %c0_12 = arith.constant 0 : index
    %c0_13 = arith.constant 0 : index
    %42 = vector.load %arg3[%c0_12, %c0_13] : memref<8x128xf32, #tpu.memory_space<vmem>>, vector<8x128xf32>
    tpu.vector_store %arg3[%c0_12, %c0_13], %41 {strides = array<i32>} : memref<8x128xf32, #tpu.memory_space<vmem>>, vector<8x128xf32>,
    %43 = vector.extract_strided_slice %41 {offsets = [7, 0], sizes = [1, 128], strides = [1, 1]} : vector<8x128xf32> to vector<1x128xf32>
    %c0_14 = arith.constant 0 : index
    %c0_15 = arith.constant 0 : index
    %44 = vector.load %arg4[%c0_14, %c0_15] : memref<1x128xf32, #tpu.memory_space<vmem>>, vector<1x128xf32>
    tpu.vector_store %arg4[%c0_14, %c0_15], %43 {strides = array<i32>} : memref<1x128xf32, #tpu.memory_space<vmem>>, vector<1x128xf32>,
    return
  }
  func.func @transform_0(%arg0: i32) -> (i32, i32) {
    %c0_i32 = arith.constant 0 : i32
    %c0_i32_0 = arith.constant 0 : i32
    return %arg0, %c0_i32 : i32, i32
  }
  func.func @transform_1(%arg0: i32) -> (i32, i32) {
    %c0_i32 = arith.constant 0 : i32
    %c0_i32_0 = arith.constant 0 : i32
    %c0_i32_1 = arith.constant 0 : i32
    return %c0_i32, %c0_i32_0 : i32, i32
  }
  func.func @transform_2(%arg0: i32) -> (i32, i32) {
    %c0_i32 = arith.constant 0 : i32
    %c0_i32_0 = arith.constant 0 : i32
    return %arg0, %c0_i32 : i32, i32
  }
}

</mosaic_0001>

<bundles_post_ra>
// kernel: tpu_custom_call.1
= control target key start
LH: loop header
LB: loop body
LE: loop exit
PB: predicated region body
PF: predicated region fallthrough
CT: control target
= control target key end

     0   :  { %7 = vsyncpa [#allocation4], 0  ;;  %s654_s0 = inlined_call_operand.hbm [shape: f32[16,128], index: 0, kind: input, shape index: {}]   ;;  %s655_s1 = inlined_call_operand.vmem [shape: f32[1,128], index: 1, kind: input, shape index: {}]   ;;  %s656_s2 = inlined_call_operand.hbm [shape: f32[16,128], index: 2, kind: output, shape index: {}]  }
   0x1   :  { %9 = vsyncpa [#allocation4 + $0x1], 0 }
   0x2   :  { %10 = vsyncpa [#allocation5], 0 }
   0x3   :  { %12 = vsyncpa [#allocation5 + $0x1], 0  ;;  %s485_s9 = smov 0   ;;  %s487_s10 = smov 0  }
   0x4   :  { %s489_s11 = smov 0   ;;  %s491_s12 = smov 0  }
   0x5 LB: > { %s506_s13 = sadd.s32 4294967295, %s465_s12   ;;  %s308_s14 = sadd.s32 4294967294, %s465_s12   ;;  %s465_s12 = sphi %s491_s12, %s671_s12   ;;  %s461_s11 = sphi %s489_s11, %s670_s11   ;;  %s457_s10 = sphi %s487_s10, %s669_s10   ;;  %s453_s9 = sphi %s485_s9, %s668_s9  }
   0x6   : > { %s510_s15 = sadd.s32 1, %s465_s12   ;;  %s25_s16 = sadd.s32 1, %s461_s11 }
   0x7   : > { %s22_s17 = ssub.s32 %s465_s12, %s510_s15  ;;  %p32_p0 = scmp.ne.s32.totalorder %s461_s11, %s457_s10 }
   0x8   : > { %p23_p1 = scmp.eq.s32.totalorder %s22_s17, 0  ;;  %p33_p2 = scmp.eq.s32.totalorder %s465_s12, 0 }
   0x9   : > { %p38_p3 = scmp.ne.s32.totalorder %s457_s10, %s453_s9  ;;  %p39_p4 = scmp.eq.s32.totalorder %s506_s13, 0 }
   0xa   : > { %s522_s18 = scalar_select %p23_p1, %s461_s11, %s25_s16  }
   0xb   : > { %p524_p5 = por %p33_p2, %p32_p0  ;;  %p528_p6 = por %p39_p4, %p38_p3 }
   0xc   : > { %p83_p7 = scmp.eq.s32.totalorder %s506_s13, 1  ;;  %p89_p8 = scmp.eq.s32.totalorder %s308_s14, 1 }
   0xd   : > { %p334_p10 = scmp.lt.s32.totalorder %s465_s12, 2  ;;  %s112_s23 = sand.u32 1, %s461_s11  }
   0xe   : > { %p535_p11 = por %p83_p7, %p32_p0  ;;  %p539_p12 = por %p89_p8, %p38_p3 }
   0xf   : > { %s312_s24 = sshll.u32 %s465_s12, 7  ;;  %s311_s25 = sshll.u32 %s112_s23, 3 }
  0x10   : > { %s660_s21 = scalar_select %p535_p11, 1, 0 }
  0x11   : > { %s661_s22 = scalar_select %p539_p12, 1, 0 }
  0x12   : > { %s548_s28 = scalar_lea.hbm %s654_s0, %s312_s24  ;;  %s116_s29 = scalar_lea.vmem [#allocation3], %s311_s25 }
  0x13   : > { %s123_s30 = sshll.u32 %s116_s29, 4  ;;  %p552_p13 = pnand %p334_p10, %p524_p5  ;;  %s556_s30 = int_to_ptr.vmem [resolvable:$true] %s123_s30 }
  0x14   : > { %s113_s4 = scalar_lea.sflag [#allocation4], %s112_s23  ;;  %s369_s5 = scalar_lea.hbm %s548_s28, 128 }
  0x15   : > { %p370_p2 = scmp.ne.s32.totalorder %s548_s28, %s369_s5  ;;  %p371_p3 = pneg %p552_p13 }
  0x16   : > { %s374_s8 = scalar_lea.hbm %s654_s0, 256  ;;  %p375_p5 = scmp.lt.u32.totalorder %s548_s28, %s654_s0 }
  0x17   : > { %p372_p4 = pnand %p371_p3, %p370_p2  ;;  %p376_p8 = scmp.lt.u32.totalorder %s374_s8, %s369_s5 }
  0x18   : > { %p378_p9 = scmp.lt.u32.totalorder %s369_s5, %s548_s28 }
  0x19   : > { %p373_p7 = pneg %p372_p4  ;;  %p377_p10 = por %p376_p8, %p375_p5 }
  0x1b   : > { %p379_p0 = por %p378_p9, %p377_p10 }
  0x1d   : > { %p380_p1 = pnand %p379_p0, %p373_p7 }
  0x1f   : > { %383 = shalt.err (!%p380_p1)
}
  0x20   : > { %s384_s17 = scalar_lea.vmem %s556_s30, 128  ;;  %s467_s19 = smov [#allocation3]  }
  0x21   : > { %p385_p2 = scmp.ne.s32.totalorder %s556_s30, %s384_s17  ;;  %s389_s23 = sshll.u32 %s467_s19, 4  ;;  %s390_s23 = int_to_ptr.vmem [resolvable:$false] %s389_s23 }
  0x22   : > { %s391_s24 = scalar_lea.vmem %s390_s23, 256  ;;  %p392_p11 = scmp.lt.s32.totalorder %s556_s30, %s390_s23 }
  0x23   : > { %p387_p4 = pnand %p385_p2, %p371_p3  ;;  %p393_p5 = scmp.lt.s32.totalorder %s391_s24, %s384_s17 }
  0x25   : > { %p388_p12 = pneg %p387_p4  ;;  %p394_p8 = por %p393_p5, %p392_p11 }
  0x27   : > { %p395_p9 = pnand %p394_p8, %p388_p12 }
  0x29   : > { %398 = shalt.err (!%p395_p9)
}
  0x2a   : > { %329 = dma.hbm_to_vmem [thread:$0]  (!%p552_p13), %s548_s28, 128, %s556_s30, %s113_s4  }
  0x2b   : > { %p663_p0 = scmp.lt.s32.totalorder %s465_s12, 3  ;;  %p664_p1 = scmp.ge.s32.totalorder %s465_s12, 1 }
  0x2d   : > { %p129_p3 = pnand %p664_p1, %p663_p0 }
  0x2e   : > { %s590_s25 = sand.u32 (!%p129_p3), 1, %s457_s10  }
  0x2f   : > { %132 = sbr.rel (%p129_p3) target bundleno = 111 (0x6f), region = 28  ;;  %s314_s26 = sshll.u32 (!%p129_p3), %s590_s25, 3 }
  0x30   : > { %s135_s27 = scalar_lea.sflag (!%p129_p3), [#allocation4], %s590_s25  ;;  %s138_s29 = scalar_lea.vmem (!%p129_p3), [#allocation3], %s314_s26 }
  0x36   : > { %444 = dma.done.wait (%p528_p6), %s135_s27, 128  }
  0x37   : > { %446 = vsyncadd (%p528_p6), %s135_s27, 4294967168  ;;  %s598_s3 = scalar_lea.vmem [#allocation6], %s314_s26  ;;  %p316_p11 = scmp.ne.s32.totalorder %s506_s13, 0 }
  0x38   : > { %v468_v0 = vmov (!%p316_p11), 0.0  }
  0x39   : > { %162 = sbr.rel (%p316_p11) target bundleno = 64 (0x40), region = 36  ;;  %163 = vst [vmem:[#allocation2] sm:$0x1] (!%p316_p11), %v468_v0 }
  0x40 PF: > { %v168_v1 = vlaneseq  ;;  %v164_v2 = vld [vmem:[%s655_s1] sm:$0x1]  ;;  %v165_v6 = vld [vmem:[%s138_s29] sm:$0xff]  ;;  %vm180_vm0 = vcmask 1040384   ;;  %vm192_vm1 = vcmask 1041408   ;;  %vm204_vm2 = vcmask 1043456  }
  0x41   : > { %v166_v3 = vsub.f32 1.0, %v164_v2  ;;  %v317_v27 = vld [vmem:[#allocation2] ss:$0 sm:$0xff]  ;;  %s319_s20 = sshll.u32 %s506_s13, 7  ;;  %s238_s4 = sshll.u32 %s598_s3, 4  ;;  %s611_s4 = int_to_ptr.vmem [resolvable:$true] %s238_s4 }
  0x42   : > { %v169_v4 = vshrl.u32 %v168_v1, 7  ;;  %s609_s7 = scalar_lea.hbm %s656_s2, %s319_s20  ;;  %s225_s8 = scalar_lea.sflag [#allocation5], %s590_s25 }
  0x43   : > { %s399_s14 = scalar_lea.vmem %s611_s4, 128  ;;  %p665_p12 = scmp.ne.s32.totalorder %s660_s21, 0 }
  0x44   : > { %v170_v5 = vsub.s32 0, %v169_v4  ;;  %p400_p6 = scmp.ne.s32.totalorder %s611_s4, %s399_s14  ;;  %s469_s13 = smov [#allocation6]  }
  0x45   : > { %s403_s16 = sshll.u32 %s469_s13, 4  ;;  %s404_s16 = int_to_ptr.vmem [resolvable:$false] %s403_s16 }
  0x46   : > { %v171_v7 = vrot.slane %v166_v3, %v170_v5  ;;  %v177_v8 = vrot.slane %v164_v2, %v170_v5  ;;  %p401_p13 = pnand %p400_p6, %p665_p12  ;;  %s405_s17 = scalar_lea.vmem %s404_s16, 256 }
  0x47   : > { %p406_p10 = scmp.lt.s32.totalorder %s611_s4, %s404_s16  ;;  %p407_p2 = scmp.lt.s32.totalorder %s405_s17, %s399_s14 }
  0x48   : > { %v179_v9 = vmul.f32 %v177_v8, %v165_v6  ;;  %v181_v10 = vsel %vm180_vm0, 1.0, %v171_v7  ;;  %p402_p7 = pneg %p401_p13 }
  0x49   : > { %v188_v11 = vmul.f32 %v181_v10, %v171_v7  ;;  %p408_p4 = por %p407_p2, %p406_p10 }
  0x4a   : > { %v183_v12 = vrot.slane %v179_v9, 7 }
  0x4b   : > { %v190_v13 = vrot.slane %v188_v11, 6  ;;  %p409_p5 = pnand %p408_p4, %p402_p7 }
  0x4c   : > { %v185_v14 = vsel %vm180_vm0, 0.0, %v183_v12 }
  0x4d   : > { %v186_v15 = vmul.f32 %v185_v14, %v171_v7  ;;  %v193_v16 = vsel %vm192_vm1, 1.0, %v190_v13 }
  0x4e   : > { %v200_v17 = vmul.f32 %v193_v16, %v188_v11 }
  0x4f   : > { %v187_v18 = vadd.f32 %v186_v15, %v179_v9 }
  0x50   : > { %v202_v19 = vrot.slane %v200_v17, 4 }
  0x51   : > { %v195_v20 = vrot.slane %v187_v18, 6 }
  0x52   : > { %v205_v23 = vsel %vm204_vm2, 1.0, %v202_v19 }
  0x53   : > { %v197_v21 = vsel %vm192_vm1, 0.0, %v195_v20  ;;  %v212_v25 = vmul.f32 %v205_v23, %v200_v17 }
  0x54   : > { %v198_v22 = vmul.f32 %v197_v21, %v188_v11 }
  0x55   : > { %v220_v30 = vmul.f32 %v317_v27, %v212_v25 }
  0x56   : > { %v199_v24 = vadd.f32 %v198_v22, %v187_v18 }
  0x58   : > { %v207_v26 = vrot.slane %v199_v24, 4 }
  0x5a   : > { %v209_v28 = vsel %vm204_vm2, 0.0, %v207_v26 }
  0x5b   : > { %v210_v29 = vmul.f32 %v209_v28, %v200_v17 }
  0x5d   : > { %v211_v31 = vadd.f32 %v210_v29, %v199_v24 }
  0x5f   : > { %v221_v32 = vadd.f32 %v220_v30, %v211_v31 }
  0x61   : > { %222 = vst [vmem:[%s598_s3] sm:$0xff] %v221_v32  ;;  %223 = vst [vmem:[#allocation2 - $0x7] sm:$0x80] %v221_v32 }
  0x62   : > { %412 = shalt.err (!%p409_p5)
}
  0x63   : > { %s413_s19 = scalar_lea.hbm %s609_s7, 128  ;;  %s417_s25 = scalar_lea.hbm %s656_s2, 256 }
  0x64   : > { %p414_p8 = scmp.ne.s32.totalorder %s609_s7, %s413_s19  ;;  %p418_p1 = scmp.lt.u32.totalorder %s609_s7, %s656_s2 }
  0x65   : > { %p419_p3 = scmp.lt.u32.totalorder %s417_s25, %s413_s19  ;;  %p421_p6 = scmp.lt.u32.totalorder %s413_s19, %s609_s7 }
  0x66   : > { %p415_p9 = pnand %p414_p8, %p665_p12 }
  0x67   : > { %p420_p11 = por %p419_p3, %p418_p1 }
  0x68   : > { %p416_p0 = pneg %p415_p9 }
  0x69   : > { %p422_p13 = por %p421_p6, %p420_p11 }
  0x6b   : > { %p423_p7 = pnand %p422_p13, %p416_p0 }
  0x6d   : > { %426 = shalt.err (!%p423_p7)
}
  0x6e   : > { %324 = dma.vmem_to_hbm [thread:$0]  (%p665_p12), %s611_s4, 128, %s609_s7, %s225_s8  }
  0x6f PF: > { %s250_s29 = sand.u32 1, %s453_s9   ;;  %p666_p10 = scmp.ne.s32.totalorder %s661_s22, 0 }
  0x70   : > { %p667_p2 = scmp.ge.s32.totalorder %s465_s12, 2  ;;  %s251_s3 = scalar_lea.sflag [#allocation5], %s250_s29 }
  0x72   : > { %p331_p4 = pnand %p667_p2, %p666_p10 }
  0x74   : > { %448 = dma.done.wait (!%p331_p4), %s251_s3, 128  }
  0x75   : > { %450 = vsyncadd (!%p331_p4), %s251_s3, 4294967168  ;;  %p15_p5 = scmp.ge.s32.totalorder %s510_s15, 4   ;;  %s668_s9 = smov %s457_s10 }
  0x76   : > { %s669_s10 = smov %s461_s11  ;;  %s670_s11 = smov %s522_s18 }
  0x77   : > { %s671_s12 = smov %s510_s15  ;;  %17 = sbr.rel (!%p15_p5) target bundleno = 5 (0x5), region = 77 }
  0x7e   :  { %256 = vsyncpa [#allocation4], 1 }
  0x7f   :  { %258 = vsyncpa [#allocation4 + $0x1], 1 }
  0x80   :  { %259 = vsyncpa [#allocation5], 1 }
  0x81   :  { %261 = vsyncpa [#allocation5 + $0x1], 1 }

</bundles_post_ra>
